<compile_context>
chip_gen: v5e
topology: v5e:2x2
jax: 0.10.0
libtpu: 0.0.40
codegen_flags: <defaults>
</compile_context>

<pallas_src>
import functools

import jax
import jax.numpy as jnp
import numpy as np
from jax import lax
from jax.experimental import pallas as pl
from jax.experimental.pallas import tpu as pltpu
from jax.scipy.linalg import block_diag

_NEG = np.float32(-1e30)
_VMEM_LIMIT = 32 * 1024 * 1024
_COMPILER_PARAMS = pltpu.CompilerParams(vmem_limit_bytes=_VMEM_LIMIT)


# ----------------------------------------------------------------------------
# In-kernel helpers
# ----------------------------------------------------------------------------
def _leaky_relu(x):
    return jnp.where(x > 0, x, 0.01 * x)


def _mm(a, b):
    """MXU matmul with native bf16 operands and f32 accumulation."""
    return jnp.dot(a.astype(jnp.bfloat16), b.astype(jnp.bfloat16),
                   preferred_element_type=jnp.float32)


def _fused_wap(fea_parts, wg1_parts, wm1_parts,
               bg1, wg2, bg2, bm1, wm2, bm2,
               pow_row, log_w_items, onehot_b, onehot, scatter,
               n_heads, f_len):
    """All heads of one WeightedAttentionPooling, fused.

    fea_parts[i] @ wg1_parts[i] are summed to form the gate hidden layer (the
    split implements torch.cat([self, nbr], dim=1) without a lane concat).
    Second layers use block-diagonal fused weights so `gate` is (items, H) and
    `msg` is (items, H*F).  Returns mean over heads of
    scatter_add(softmax_gate * msg) -> (n_segments, f_len).
    """
    gh = bg1
    mh = bm1
    for fp, gw, mw in zip(fea_parts, wg1_parts, wm1_parts):
        gh = gh + _mm(fp, gw)
        mh = mh + _mm(fp, mw)
    gh = _leaky_relu(gh)
    mh = _leaky_relu(mh)
    gate = _mm(gh, wg2) + bg2                                    # (items, H)
    msg = _mm(mh, wm2) + bm2                                     # (items, H*F)

    # scatter_max over segments: masked sublane reduction, one head at a time.
    seg_max = jnp.concatenate(
        [jnp.max(jnp.where(onehot_b, gate[:, h:h + 1], _NEG),
                 axis=0, keepdims=True)
         for h in range(n_heads)], axis=0)                       # (H, S)
    # Gather the per-segment max back per item with an exact one-hot selection
    # matmul (MXU) instead of a masked cross-lane reduction (XLU).
    gate_max = lax.dot_general(
        onehot, seg_max, (((1,), (1,)), ((), ())),
        preferred_element_type=jnp.float32)                      # (items, H)

    # weighted softmax: (w ** pow) * exp(gate - seg_max) / seg_sum
    g = jnp.exp(log_w_items * pow_row + gate - gate_max)         # (items, H)
    seg_sum = jnp.dot(scatter, g, preferred_element_type=jnp.float32)   # (S, H)
    denom = jnp.dot(onehot, seg_sum, preferred_element_type=jnp.float32)  # (items, H)
    g = g / (denom + 1e-10)

    # mean over heads folded into the per-item message -> single scatter_add.
    comb = g[:, 0:1] * msg[:, 0:f_len]
    for h in range(1, n_heads):
        comb = comb + g[:, h:h + 1] * msg[:, h * f_len:(h + 1) * f_len]
    comb = comb * jnp.float32(1.0 / n_heads)
    return jnp.dot(scatter, comb, preferred_element_type=jnp.float32)    # (S, F)


# ----------------------------------------------------------------------------
# Pallas kernels
# ----------------------------------------------------------------------------
def _embed_kernel(x_ref, w_ref, b_ref, o_ref):
    o_ref[...] = _mm(x_ref[...], w_ref[...]) + b_ref[...]


def _message_layer_kernel(x_ref, logw_ref, self_col_ref, self_row_ref,
                          nbr_col_ref,
                          wg1a_ref, wg1b_ref, bg1_ref, wg2_ref, bg2_ref,
                          wm1a_ref, wm1b_ref, bm1_ref, wm2_ref, bm2_ref,
                          pow_ref, o_ref, *, n_heads):
    """One full MessageLayer (all heads) including gathers and residual."""
    x = x_ref[...]                                   # (N, F) f32
    n_nodes, f_len = x.shape
    m_edges = self_col_ref.shape[0]

    # One-hot gather / scatter matrices built in-kernel from int32 indices.
    iota_mn = lax.broadcasted_iota(jnp.int32, (m_edges, n_nodes), 1)
    onehot_self_b = self_col_ref[...] == iota_mn                  # (M, N)
    onehot_self = onehot_self_b.astype(jnp.float32)
    onehot_nbr = (nbr_col_ref[...] == iota_mn).astype(jnp.float32)
    iota_nm = lax.broadcasted_iota(jnp.int32, (n_nodes, m_edges), 0)
    scatter_self = (self_row_ref[...] == iota_nm).astype(jnp.float32)  # (N, M)

    # Per-edge gathers as exact one-hot MXU selection matmuls.
    fea_self = jnp.dot(onehot_self, x, preferred_element_type=jnp.float32)
    fea_nbr = jnp.dot(onehot_nbr, x, preferred_element_type=jnp.float32)
    logw_nbr = jnp.dot(onehot_nbr, logw_ref[...],
                       preferred_element_type=jnp.float32)        # (M, 1)

    pooled = _fused_wap(
        [fea_self, fea_nbr],
        [wg1a_ref[...], wg1b_ref[...]], [wm1a_ref[...], wm1b_ref[...]],
        bg1_ref[...], wg2_ref[...], bg2_ref[...],
        bm1_ref[...], wm2_ref[...], bm2_ref[...],
        pow_ref[...], logw_nbr,
        onehot_self_b, onehot_self, scatter_self, n_heads, f_len)
    o_ref[...] = pooled + x                          # residual


def _cry_pool_kernel(x_ref, logw_ref, cry_col_ref, cry_row_ref,
                     wg1_ref, bg1_ref, wg2_ref, bg2_ref,
                     wm1_ref, bm1_ref, wm2_ref, bm2_ref,
                     pow_ref, o_ref, *, n_heads):
    """All crystal-pool attention heads fused into one kernel."""
    x = x_ref[...]                                   # (N, F)
    n_items, f_len = x.shape
    n_cry = o_ref.shape[0]

    iota_nc = lax.broadcasted_iota(jnp.int32, (n_items, n_cry), 1)
    onehot_b = cry_col_ref[...] == iota_nc                        # (N, C)
    onehot = onehot_b.astype(jnp.float32)
    iota_cn = lax.broadcasted_iota(jnp.int32, (n_cry, n_items), 0)
    scatter = (cry_row_ref[...] == iota_cn).astype(jnp.float32)   # (C, N)

    o_ref[...] = _fused_wap(
        [x], [wg1_ref[...]], [wm1_ref[...]],
        bg1_ref[...], wg2_ref[...], bg2_ref[...],
        bm1_ref[...], wm2_ref[...], bm2_ref[...],
        pow_ref[...], logw_ref[...],
        onehot_b, onehot, scatter, n_heads, f_len)


# ----------------------------------------------------------------------------
# pallas_call wrappers
# ----------------------------------------------------------------------------
def _vmem_specs(n):
    return [pl.BlockSpec(memory_space=pltpu.MemorySpace.VMEM)] * n


def embedding_linear(x, w_bf16, b):
    return pl.pallas_call(
        _embed_kernel,
        out_shape=jax.ShapeDtypeStruct((x.shape[0], w_bf16.shape[1]), jnp.float32),
        in_specs=_vmem_specs(3),
        out_specs=pl.BlockSpec(memory_space=pltpu.MemorySpace.VMEM),
        compiler_params=_COMPILER_PARAMS,
    )(x, w_bf16, b)


def message_layer(x, log_w, self_col, self_row, nbr_col, packed):
    n, f = x.shape
    n_heads = packed["pow"].shape[1]
    kernel = functools.partial(_message_layer_kernel, n_heads=n_heads)
    return pl.pallas_call(
        kernel,
        out_shape=jax.ShapeDtypeStruct((n, f), jnp.float32),
        in_specs=_vmem_specs(16),
        out_specs=pl.BlockSpec(memory_space=pltpu.MemorySpace.VMEM),
        compiler_params=_COMPILER_PARAMS,
    )(x, log_w, self_col, self_row, nbr_col,
      packed["wg1a"], packed["wg1b"], packed["bg1"], packed["wg2"], packed["bg2"],
      packed["wm1a"], packed["wm1b"], packed["bm1"], packed["wm2"], packed["bm2"],
      packed["pow"])


def crystal_pool(x, log_w, cry_col, cry_row, n_crystals, packed):
    f = x.shape[1]
    n_heads = packed["pow"].shape[1]
    kernel = functools.partial(_cry_pool_kernel, n_heads=n_heads)
    return pl.pallas_call(
        kernel,
        out_shape=jax.ShapeDtypeStruct((n_crystals, f), jnp.float32),
        in_specs=_vmem_specs(13),
        out_specs=pl.BlockSpec(memory_space=pltpu.MemorySpace.VMEM),
        compiler_params=_COMPILER_PARAMS,
    )(x, log_w, cry_col, cry_row,
      packed["wg1"], packed["bg1"], packed["wg2"], packed["bg2"],
      packed["wm1"], packed["bm1"], packed["wm2"], packed["bm2"],
      packed["pow"])


# ----------------------------------------------------------------------------
# Parameter init (per-head, matches module shapes) and head fusion / packing
# ----------------------------------------------------------------------------
def init_simple_net(key, d_in, hidden_dims, d_out, scale=0.1):
    assert len(hidden_dims) == 1
    h = hidden_dims[0]
    k = jax.random.split(key, 4)
    return {
        "w1": scale * jax.random.normal(k[0], (d_in, h), jnp.float32),
        "b1": scale * jax.random.normal(k[1], (1, h), jnp.float32),
        "w2": scale * jax.random.normal(k[2], (h, d_out), jnp.float32),
        "b2": scale * jax.random.normal(k[3], (1, d_out), jnp.float32),
    }


def init_wap(key, d_in, d_out, gate_hidden, msg_hidden):
    kg, km, kp = jax.random.split(key, 3)
    return {
        "gate": init_simple_net(kg, d_in, gate_hidden, 1),
        "msg": init_simple_net(km, d_in, msg_hidden, d_out),
        "pow": jax.random.normal(kp, (1, 1), jnp.float32),
    }


def init_descriptor_network(key, elem_emb_len, elem_fea_len, n_graph,
                            elem_heads, elem_gate, elem_msg,
                            cry_heads, cry_gate, cry_msg):
    k_emb, k_graphs, k_cry = jax.random.split(key, 3)
    ke = jax.random.split(k_emb, 2)
    params = {
        "emb_w": 0.1 * jax.random.normal(ke[0], (elem_emb_len, elem_fea_len - 1),
                                         jnp.float32),
        "emb_b": 0.1 * jax.random.normal(ke[1], (1, elem_fea_len - 1), jnp.float32),
        "graphs": [],
        "cry_pool": [],
    }
    gkeys = jax.random.split(k_graphs, n_graph * elem_heads)
    for g in range(n_graph):
        layer = []
        for h in range(elem_heads):
            layer.append(init_wap(gkeys[g * elem_heads + h],
                                  2 * elem_fea_len, elem_fea_len,
                                  elem_gate, elem_msg))
        params["graphs"].append(layer)
    ckeys = jax.random.split(k_cry, cry_heads)
    for h in range(cry_heads):
        params["cry_pool"].append(init_wap(ckeys[h], elem_fea_len, elem_fea_len,
                                           cry_gate, cry_msg))
    return params


def _pack_heads(heads, split_input=False):
    """Fuse all heads: hidden layers side-by-side, second layers block-diag.

    Matmul weights are stored in bf16 (MXU-native), biases / pow stay f32.
    """
    bf16 = jnp.bfloat16
    wg1 = jnp.concatenate([h["gate"]["w1"] for h in heads], axis=1)
    wm1 = jnp.concatenate([h["msg"]["w1"] for h in heads], axis=1)
    packed = {
        "bg1": jnp.concatenate([h["gate"]["b1"] for h in heads], axis=1),
        "wg2": block_diag(*[h["gate"]["w2"] for h in heads]).astype(bf16),
        "bg2": jnp.concatenate([h["gate"]["b2"] for h in heads], axis=1),
        "bm1": jnp.concatenate([h["msg"]["b1"] for h in heads], axis=1),
        "wm2": block_diag(*[h["msg"]["w2"] for h in heads]).astype(bf16),
        "bm2": jnp.concatenate([h["msg"]["b2"] for h in heads], axis=1),
        "pow": jnp.concatenate([h["pow"] for h in heads], axis=1),
    }
    if split_input:  # input is torch.cat([self, nbr]); split W1 instead of fea
        f = wg1.shape[0] // 2
        packed.update(wg1a=wg1[:f].astype(bf16), wg1b=wg1[f:].astype(bf16),
                      wm1a=wm1[:f].astype(bf16), wm1b=wm1[f:].astype(bf16))
    else:
        packed.update(wg1=wg1.astype(bf16), wm1=wm1.astype(bf16))
    return packed


def pack_descriptor_params(params):
    return {
        "emb_w": params["emb_w"].astype(jnp.bfloat16),
        "emb_b": params["emb_b"],
        "graphs": [_pack_heads(layer, split_input=True)
                   for layer in params["graphs"]],
        "cry_pool": _pack_heads(params["cry_pool"], split_input=False),
    }


# ----------------------------------------------------------------------------
# Forward pass (Pallas kernels; only trivial glue outside)
# ----------------------------------------------------------------------------
def descriptor_forward(params, elem_weights, elem_fea, self_fea_idx,
                       nbr_fea_idx, cry_elem_idx, n_crystals):
    packed = pack_descriptor_params(params)
    n = elem_fea.shape[0]
    m = self_fea_idx.shape[0]

    # embedding + append fractional weight column
    x = embedding_linear(elem_fea, packed["emb_w"], packed["emb_b"])  # (N, F-1)
    x = jnp.concatenate([x, elem_weights], axis=1)                    # (N, F)

    # hoisted once per forward; shared by every layer / head
    log_w = jnp.log(elem_weights)                                     # (N, 1)
    self_col = self_fea_idx.astype(jnp.int32).reshape(m, 1)
    self_row = self_fea_idx.astype(jnp.int32).reshape(1, m)
    nbr_col = nbr_fea_idx.astype(jnp.int32).reshape(m, 1)
    cry_col = cry_elem_idx.astype(jnp.int32).reshape(n, 1)
    cry_row = cry_elem_idx.astype(jnp.int32).reshape(1, n)

    for layer_packed in packed["graphs"]:
        x = message_layer(x, log_w, self_col, self_row, nbr_col, layer_packed)

    return crystal_pool(x, log_w, cry_col, cry_row, n_crystals,
                        packed["cry_pool"])


# ----------------------------------------------------------------------------
# Pure-JAX reference (mirrors the PyTorch semantics) for verification
# ----------------------------------------------------------------------------
def _simple_net_ref(x, p):
    h = _leaky_relu(x @ p["w1"] + p["b1"])
    return h @ p["w2"] + p["b2"]


def _wap_ref(x, index, weights, head, num_segments):
    gate = _simple_net_ref(x, head["gate"])
    seg_max = jax.ops.segment_max(gate, index, num_segments=num_segments)
    gate = gate - seg_max[index]
    gate = (weights ** head["pow"][0, 0]) * jnp.exp(gate)
    denom = jax.ops.segment_sum(gate, index, num_segments=num_segments)
    gate = gate / (denom[index] + 1e-10)
    msg = _simple_net_ref(x, head["msg"])
    return jax.ops.segment_sum(gate * msg, index, num_segments=num_segments)


def descriptor_forward_ref(params, elem_weights, elem_fea, self_fea_idx,
                           nbr_fea_idx, cry_elem_idx, n_crystals):
    n = elem_fea.shape[0]
    x = elem_fea @ params["emb_w"] + params["emb_b"]
    x = jnp.concatenate([x, elem_weights], axis=1)
    for layer_heads in params["graphs"]:
        fea = jnp.concatenate([x[self_fea_idx], x[nbr_fea_idx]], axis=1)
        nbr_w = elem_weights[nbr_fea_idx]
        heads = [_wap_ref(fea, self_fea_idx, nbr_w, h, n) for h in layer_heads]
        x = jnp.mean(jnp.stack(heads, axis=0), axis=0) + x
    heads = [_wap_ref(x, cry_elem_idx, elem_weights, h, n_crystals)
             for h in params["cry_pool"]]
    return jnp.mean(jnp.stack(heads, axis=0), axis=0)


# ----------------------------------------------------------------------------
if __name__ == "__main__":
    key = jax.random.PRNGKey(0)

    # small synthetic stoichiometry graph: C=2 crystals, 4 elements each
    N, C = 8, 2
    elem_emb_len, elem_fea_len = 16, 32
    n_graph, elem_heads, cry_heads = 2, 2, 2
    hidden = [64]

    cry_elem_idx = jnp.array([0, 0, 0, 0, 1, 1, 1, 1], dtype=jnp.int32)
    self_idx, nbr_idx = [], []
    for c in range(C):
        nodes = list(range(c * 4, (c + 1) * 4))
        for i in nodes:
            for j in nodes:
                self_idx.append(i)
                nbr_idx.append(j)
    self_fea_idx = jnp.array(self_idx, dtype=jnp.int32)   # (M,) with M = 32
    nbr_fea_idx = jnp.array(nbr_idx, dtype=jnp.int32)

    k1, k2, k3 = jax.random.split(key, 3)
    elem_fea = jax.random.normal(k1, (N, elem_emb_len), jnp.float32)
    raw_w = jax.random.uniform(k2, (N,), jnp.float32, minval=0.1, maxval=1.0)
    w_sum = jax.ops.segment_sum(raw_w, cry_elem_idx, num_segments=C)
    elem_weights = (raw_w / w_sum[cry_elem_idx]).reshape(N, 1)   # positive

    params = init_descriptor_network(
        k3, elem_emb_len, elem_fea_len, n_graph,
        elem_heads, hidden, hidden, cry_heads, hidden, hidden)

    out = descriptor_forward(params, elem_weights, elem_fea, self_fea_idx,
                             nbr_fea_idx, cry_elem_idx, C)
    out = jax.block_until_ready(out)

    # reference in full f32 precision (kernel uses bf16 MXU inputs)
    with jax.default_matmul_precision("highest"):
        ref = descriptor_forward_ref(params, elem_weights, elem_fea,
                                     self_fea_idx, nbr_fea_idx,
                                     cry_elem_idx, C)
        ref = jax.block_until_ready(ref)

    np.testing.assert_allclose(np.asarray(out), np.asarray(ref),
                               rtol=1e-2, atol=1e-2)
    print("KERNEL_OK")
</pallas_src>

<mosaic_0001>
module attributes {stable_mosaic.version = 11 : i64} {
  func.func @_embed_kernel(%arg0: memref<8x16xf32, #tpu.memory_space<vmem>>, %arg1: memref<16x31xbf16, #tpu.memory_space<vmem>>, %arg2: memref<1x31xf32, #tpu.memory_space<vmem>>, %arg3: memref<8x31xf32, #tpu.memory_space<vmem>>) attributes {dimension_semantics = [], scalar_prefetch = 0 : i64, scratch_operands = 0 : i64, tpu.core_type = #tpu.core_type<tc>} {
    %c0 = arith.constant 0 : index
    %c0_0 = arith.constant 0 : index
    %0 = vector.load %arg0[%c0, %c0_0] : memref<8x16xf32, #tpu.memory_space<vmem>>, vector<8x16xf32>
    %c0_1 = arith.constant 0 : index
    %c0_2 = arith.constant 0 : index
    %1 = vector.load %arg1[%c0_1, %c0_2] : memref<16x31xbf16, #tpu.memory_space<vmem>>, vector<16x31xbf16>
    %2 = arith.truncf %0 : vector<8x16xf32> to vector<8x16xbf16>
    %cst = arith.constant dense<0.000000e+00> : vector<8x31xf32>
    %3 = tpu.matmul %2, %1, %cst {dimension_numbers = #tpu.dot_dimension_numbers<[1], [0], [0], [1], [0, 0, 1, 1], [], []>} : vector<8x16xbf16>, vector<16x31xbf16>, vector<8x31xf32> -> vector<8x31xf32>
    %c0_3 = arith.constant 0 : index
    %c0_4 = arith.constant 0 : index
    %4 = vector.load %arg2[%c0_3, %c0_4] : memref<1x31xf32, #tpu.memory_space<vmem>>, vector<1x31xf32>
    %5 = vector.broadcast %4 : vector<1x31xf32> to vector<8x31xf32>
    %6 = arith.addf %3, %5 : vector<8x31xf32>
    %c0_5 = arith.constant 0 : index
    %c0_6 = arith.constant 0 : index
    %7 = vector.load %arg3[%c0_5, %c0_6] : memref<8x31xf32, #tpu.memory_space<vmem>>, vector<8x31xf32>
    tpu.vector_store %arg3[%c0_5, %c0_6], %6 {strides = array<i32>} : memref<8x31xf32, #tpu.memory_space<vmem>>, vector<8x31xf32>,
    return
  }
}

</mosaic_0001>

<bundles_post_ra>
// kernel: tpu_custom_call.1
= control target key start
LH: loop header
LB: loop body
LE: loop exit
PB: predicated region body
PF: predicated region fallthrough
CT: control target
= control target key end

     0   :  { %8 = vsyncpa [#allocation3], 0  ;;  %s224_s0 = inlined_call_operand.hbm [shape: f32[8,16], index: 0, kind: input, shape index: {}]   ;;  %s225_s1 = inlined_call_operand.hbm [shape: bf16[16,31], index: 1, kind: input, shape index: {}]   ;;  %s226_s2 = inlined_call_operand.vmem [shape: f32[1,31], index: 2, kind: input, shape index: {}]   ;;  %s227_s3 = inlined_call_operand.hbm [shape: f32[8,31], index: 3, kind: output, shape index: {}]  }
   0x1   :  { %9 = vsyncpa [#allocation6], 0 }
   0x2   :  { %10 = vsyncpa [#allocation4], 0  ;;  %s16_s14 = sshll.u32 %s224_s0, 4  ;;  %s187_s15 = smov [#allocation2]   ;;  %s17_s14 = int_to_ptr.hbm [resolvable:$true] %s16_s14 }
   0x3   :  { %s18_s16 = sshll.u32 %s187_s15, 4  ;;  %s26_s19 = sshll.u32 %s225_s1, 4  ;;  %s19_s16 = int_to_ptr.vmem [resolvable:$true] %s18_s16  ;;  %s27_s19 = int_to_ptr.hbm [resolvable:$true] %s26_s19 }
   0x4   :  { %21 = dma.hbm_to_vmem [thread:$0]  %s17_s14, 128, %s19_s16, [#allocation3]  }
   0x5   :  { %s188_s20 = smov [#allocation5]   ;;  %s189_s22 = smov 64  }
   0x6   :  { %s28_s21 = sshll.u32 %s188_s20, 4  ;;  %s190_s23 = smov 4   ;;  %s29_s21 = int_to_ptr.vmem [resolvable:$true] %s28_s21 }
   0x7   :  { %34 = dma.hbm_to_vmem [thread:$0]  %s27_s19, 128, %s29_s21, [#allocation6], %s189_s22, %s189_s22, %s190_s23  }
   0x8   :  { %181 = dma.done.wait [#allocation3], 128  }
   0x9   :  { %182 = vsyncadd [#allocation3], 4294967168 }
   0xa   :  { %183 = dma.done.wait [#allocation6], 128  }
   0xb   :  { %184 = vsyncadd [#allocation6], 4294967168  ;;  %v102_v0 = vld [vmem:[#allocation5] sm:$0xff]  ;;  %v46_v1 = vld [vmem:[#allocation2] sm:$0xff]  ;;  %vm60_vm0 = vcmask 130048   ;;  %s191_s24 = smov [#allocation7]  }
   0xc   :  { %v49_v2 = vpack.c.bf16 %v46_v1, %v46_v1  ;;  %71 = vmatpush.bf16.msra.mxu0 %v102_v0  ;;  %v108_v3 = vld [vmem:[%s226_s2] ss:$0 sm:$0xff]  ;;  %s84_s25 = sshll.u32 %s191_s24, 4  ;;  %s86_s28 = sshll.u32 %s227_s3, 4  ;;  %vm77_vm1 = vcmask 252928   ;;  %s85_s25 = int_to_ptr.vmem [resolvable:$true] %s84_s25  ;;  %s87_s28 = int_to_ptr.hbm [resolvable:$true] %s86_s28 }
   0xf   :  { %101 = vmatmul.msk.bf16.vlgmr.msra.gmra.mxu0 %vm60_vm0, %v49_v2 }
  0x8c   :  { %v73_v4 = vpop.f32.mrf.mxu0 }
  0x8d   :  { %v74_v5 = vadd.f32 %v108_v3, %v73_v4 }
  0x8f   :  { %78 = vst.msk [vmem:[#allocation7] sm:$0xff] %vm77_vm1, %v74_v5 }
  0x90   :  { %89 = dma.vmem_to_hbm [thread:$0]  %s85_s25, 128, %s87_s28, [#allocation4]  }
  0x94   :  { %v75_v6 = vpop.f32.mrf.mxu0 }
  0x95   :  { %185 = dma.done.wait [#allocation4], 128  }
  0x96   :  { %186 = vsyncadd [#allocation4], 4294967168 }
  0x97   :  { %94 = vsyncpa [#allocation3], 1 }
  0x98   :  { %95 = vsyncpa [#allocation6], 1 }
  0x99   :  { %96 = vsyncpa [#allocation4], 1 }

</bundles_post_ra>
